<compile_context>
chip_gen: v7x
topology: tpu7x:2x2x1
jax: 0.10.0
libtpu: 0.0.40
codegen_flags: <defaults>
</compile_context>

<pallas_src>
import functools

import jax
import jax.numpy as jnp
from jax.experimental import pallas as pl
from jax.experimental.pallas import tpu as pltpu


def _round_up(x: int, m: int) -> int:
    return ((x + m - 1) // m) * m


def _vmem_capacity_bytes() -> int:
    """Physical VMEM of the local TPU; conservative default if unavailable."""
    try:
        return int(pltpu.get_tpu_info().vmem_capacity_bytes)
    except Exception:
        return 64 * 1024 * 1024          # v7x per-TC capacity (most restrictive)


def _choose_block_rows(batch: int, feat: int, itemsize: int,
                       tile_budget: int, sublane: int, core_split: int) -> int:
    """Byte-targeted tile rows: fill the budget, split work across cores."""
    d_pad = _round_up(feat, 128)         # lanes are padded to 128 in VMEM
    # 2 input streams x 2 pipeline buffers of the native-dtype tile, plus
    # roughly two f32 intermediate slabs (diff / diff^2) live in the body.
    bytes_per_row = (4 * itemsize + 8) * d_pad
    rows = max(sublane, tile_budget // bytes_per_row)
    per_core = _round_up(-(-batch // core_split), sublane)   # cdiv, rounded up
    rows = min(rows, per_core)
    rows = max(sublane, (rows // sublane) * sublane)
    return rows


def _contrastive_loss_kernel(y_ref, z1_ref, z2_ref, out_ref, *,
                             margin: float, batch: int, block_rows: int,
                             tiles_per_core: int):
    c = pl.program_id(0)                      # core-split index ("parallel")
    i = pl.program_id(1)                      # tile index within core ("arbitrary")
    t = c * tiles_per_core + i                # global (unclamped) tile index

    # Zero this core's partial-sum accumulator on its first tile.
    @pl.when(i == 0)
    def _():
        out_ref[...] = jnp.zeros_like(out_ref)

    # Stream tiles in native dtype (f32 / bf16); compute in f32.
    z1 = z1_ref[...].astype(jnp.float32)      # (TB, D)
    z2 = z2_ref[...].astype(jnp.float32)      # (TB, D)
    y = y_ref[0]                              # (1, TB) lane-dense labels, f32

    # Euclidean (p=2) pairwise distance per sample (lane reduce -> column).
    diff = z1 - z2
    sq_dist = jnp.sum(diff * diff, axis=-1, keepdims=True)    # (TB, 1)
    dist = jnp.sqrt(sq_dist)                                   # (TB, 1)
    hinge = jnp.maximum(margin - dist, 0.0)                    # (TB, 1)

    sim_term = 0.5 * sq_dist                                   # (1 - y) coefficient
    delta_term = 0.5 * hinge * hinge - sim_term                # y coefficient

    def _accumulate(a_col, d_col):
        # tile_sum = sum_i a_i + sum_i y_i * d_i.
        # The (1,TB) x (TB,1) matmul bridges the lane-dense y row with the
        # sublane-dense per-sample column without any transpose/relayout
        # (MXU is otherwise idle).  Split d into bf16-exact high + residual
        # low parts so the contraction stays f32-accurate even if the MXU
        # rounds operands to bf16.
        d_hi = d_col.astype(jnp.bfloat16).astype(jnp.float32)
        d_lo = d_col - d_hi
        yd = (jnp.dot(y, d_hi, preferred_element_type=jnp.float32) +
              jnp.dot(y, d_lo, preferred_element_type=jnp.float32))   # (1, 1)
        out_ref[...] += jnp.sum(a_col) + jnp.sum(yd)

    # Only tiles overlapping (or past) the batch end need row masking.
    needs_mask = (t + 1) * block_rows > batch

    @pl.when(jnp.logical_not(needs_mask))
    def _():
        _accumulate(sim_term, delta_term)

    @pl.when(needs_mask)
    def _():
        row_ids = t * block_rows + jax.lax.broadcasted_iota(
            jnp.int32, (block_rows, 1), 0)
        valid = row_ids < batch
        # Select (not multiply) so garbage padding rows cannot leak NaN/Inf.
        _accumulate(jnp.where(valid, sim_term, 0.0),
                    jnp.where(valid, delta_term, 0.0))


def contrastive_loss(y: jax.Array, z1: jax.Array, z2: jax.Array, *,
                     margin: float = 1.0, block_rows: int | None = None,
                     core_split: int = 2) -> jax.Array:
    """y: (B,) labels (0 similar, 1 dissimilar); z1, z2: (B, D) embeddings."""
    assert z1.shape == z2.shape and z1.ndim == 2
    B, D = z1.shape
    assert y.size == B

    itemsize = jnp.dtype(z1.dtype).itemsize
    sublane = {1: 32, 2: 16}.get(itemsize, 8)          # dtype-native sublane multiple

    # Generation-aware VMEM sizing.
    vmem_cap = _vmem_capacity_bytes()
    if vmem_cap >= 96 * 1024 * 1024:                   # v5e / v6e: 128 MiB VMEM
        tile_budget = 48 * 1024 * 1024
        vmem_limit = 80 * 1024 * 1024
    else:                                              # v7x (64 MiB / TC) or unknown
        tile_budget = 20 * 1024 * 1024
        vmem_limit = 32 * 1024 * 1024

    if block_rows is None:
        block_rows = _choose_block_rows(B, D, itemsize, tile_budget,
                                        sublane, core_split)
    block_rows = max(sublane, _round_up(block_rows, sublane))

    total_tiles = pl.cdiv(B, block_rows)
    tiles_per_core = pl.cdiv(total_tiles, core_split)
    grid = (core_split, tiles_per_core)

    # Lane-dense label layout: (num_tiles, 1, block_rows) f32, zero padded.
    padded = total_tiles * block_rows
    y_flat = jnp.ravel(y).astype(jnp.float32)
    y_flat = jnp.pad(y_flat, (0, padded - B))
    y3d = jnp.reshape(y_flat, (total_tiles, 1, block_rows))

    def data_map(c, i):
        # Clamp phantom tiles (past the real data) in-bounds; their rows are
        # fully masked inside the kernel so they contribute exactly 0.
        t = jnp.minimum(c * tiles_per_core + i, total_tiles - 1)
        return (t, 0)

    def label_map(c, i):
        t = jnp.minimum(c * tiles_per_core + i, total_tiles - 1)
        return (t, 0, 0)

    def out_map(c, i):
        return (c, 0, 0)

    kernel = functools.partial(
        _contrastive_loss_kernel, margin=float(margin), batch=B,
        block_rows=block_rows, tiles_per_core=tiles_per_core)

    cost = pl.CostEstimate(
        flops=3 * B * D + 12 * B,
        transcendentals=B,                               # one sqrt per sample
        bytes_accessed=2 * B * D * itemsize + 4 * B + 4 * core_split,
    )

    partials = pl.pallas_call(
        kernel,
        out_shape=jax.ShapeDtypeStruct((core_split, 1, 1), jnp.float32),
        grid_spec=pltpu.PrefetchScalarGridSpec(
            num_scalar_prefetch=0,
            grid=grid,
            in_specs=[
                pl.BlockSpec((1, 1, block_rows), label_map),   # lane-dense labels
                pl.BlockSpec((block_rows, D), data_map),       # z1 tile
                pl.BlockSpec((block_rows, D), data_map),       # z2 tile
            ],
            out_specs=pl.BlockSpec((1, 1, 1), out_map),        # per-core partial sum
        ),
        compiler_params=pltpu.CompilerParams(
            dimension_semantics=("parallel", "arbitrary"),
            vmem_limit_bytes=vmem_limit,
        ),
        cost_estimate=cost,
    )(y3d, z1, z2)

    # Tiny epilogue outside the kernel: combine per-core partials, apply mean.
    return jnp.sum(partials) * (1.0 / B)


def _reference(y, z1, z2, margin=1.0):
    dist = jnp.sqrt(jnp.sum((z1 - z2) ** 2, axis=-1))
    loss = (1.0 - y) * 0.5 * dist ** 2 + 0.5 * y * jnp.maximum(margin - dist, 0.0) ** 2
    return jnp.mean(loss)


if __name__ == "__main__":
    key = jax.random.PRNGKey(0)
    k1, k2, k3 = jax.random.split(key, 3)

    # B=20 is deliberately not a multiple of the tile size so the multi-tile
    # grid, the ragged-last-tile select mask, the phantom-tile clamp and the
    # 2-way core split all get exercised.
    B, D = 20, 32
    z1 = jax.random.normal(k1, (B, D), dtype=jnp.float32)
    z2 = jax.random.normal(k2, (B, D), dtype=jnp.float32)
    y = jax.random.bernoulli(k3, 0.5, (B,)).astype(jnp.float32)  # 0=similar, 1=dissimilar

    ref = _reference(y, z1, z2)

    # 1) forced small tiles: grid (2 cores x 2 tiles/core), ragged + phantom tile.
    loss_tiled = contrastive_loss(y, z1, z2, block_rows=8)
    jax.block_until_ready(loss_tiled)
    assert jnp.allclose(loss_tiled, ref, atol=1e-4, rtol=1e-4), (loss_tiled, ref)

    # 2) auto (byte-targeted, generation-aware) tile size, split across cores.
    loss_auto = contrastive_loss(y, z1, z2)
    jax.block_until_ready(loss_auto)
    assert jnp.allclose(loss_auto, ref, atol=1e-4, rtol=1e-4), (loss_auto, ref)

    # 3) bf16 embeddings streamed from HBM (rows auto-aligned to 16), f32 compute.
    z1b = z1.astype(jnp.bfloat16)
    z2b = z2.astype(jnp.bfloat16)
    ref_bf16 = _reference(y, z1b.astype(jnp.float32), z2b.astype(jnp.float32))
    loss_bf16 = contrastive_loss(y, z1b, z2b)
    jax.block_until_ready(loss_bf16)
    assert jnp.allclose(loss_bf16, ref_bf16, atol=1e-4, rtol=1e-4), (loss_bf16, ref_bf16)

    # 4) evenly divisible batch: every tile takes the masking-free fast path.
    B2, D2 = 32, 128
    z1e = jax.random.normal(k1, (B2, D2), dtype=jnp.float32)
    z2e = jax.random.normal(k2, (B2, D2), dtype=jnp.float32)
    ye = jax.random.bernoulli(k3, 0.5, (B2,)).astype(jnp.float32)
    ref_e = _reference(ye, z1e, z2e)
    loss_e = contrastive_loss(ye, z1e, z2e, block_rows=8)
    jax.block_until_ready(loss_e)
    assert jnp.allclose(loss_e, ref_e, atol=1e-4, rtol=1e-4), (loss_e, ref_e)

    print("KERNEL_OK")
</pallas_src>

<mosaic_0001>
module attributes {stable_mosaic.version = 11 : i64} {
  func.func @_contrastive_loss_kernel(%arg0: i32, %arg1: i32, %arg2: memref<1x1x8xf32, #tpu.memory_space<vmem>>, %arg3: memref<8x32xf32, #tpu.memory_space<vmem>>, %arg4: memref<8x32xf32, #tpu.memory_space<vmem>>, %arg5: memref<1x1x1xf32, #tpu.memory_space<vmem>>) attributes {dimension_semantics = [#tpu.dimension_semantics<parallel>, #tpu.dimension_semantics<arbitrary>], iteration_bounds = array<i64: 2, 2>, scalar_prefetch = 0 : i64, scratch_operands = 0 : i64, tpu.core_type = #tpu.core_type<tc>, window_params = [{transform_indices = @transform_0, window_bounds = array<i64: 1, 1, 8>}, {transform_indices = @transform_1, window_bounds = array<i64: 8, 32>}, {transform_indices = @transform_2, window_bounds = array<i64: 8, 32>}, {transform_indices = @transform_3, window_bounds = array<i64: 1, 1, 1>}]} {
    %c2_i32 = arith.constant 2 : i32
    %0 = arith.muli %arg0, %c2_i32 : i32
    %1 = arith.addi %0, %arg1 : i32
    %c0_i32 = arith.constant 0 : i32
    %2 = arith.cmpi eq, %arg1, %c0_i32 : i32
    %3 = arith.extui %2 : i1 to i32
    %c0_i32_0 = arith.constant 0 : i32
    %4 = arith.cmpi ne, %3, %c0_i32_0 : i32
    scf.if %4 {
      %cst_13 = arith.constant 0.000000e+00 : f32
      %32 = vector.broadcast %cst_13 : f32 to vector<1x1x1xf32>
      %c0_14 = arith.constant 0 : index
      %c0_15 = arith.constant 0 : index
      %c0_16 = arith.constant 0 : index
      %33 = vector.load %arg5[%c0_14, %c0_15, %c0_16] : memref<1x1x1xf32, #tpu.memory_space<vmem>>, vector<1x1x1xf32>
      tpu.vector_store %arg5[%c0_14, %c0_15, %c0_16], %32 {strides = array<i32>} : memref<1x1x1xf32, #tpu.memory_space<vmem>>, vector<1x1x1xf32>,
    } else {
    }
    %c0 = arith.constant 0 : index
    %c0_1 = arith.constant 0 : index
    %5 = vector.load %arg3[%c0, %c0_1] : memref<8x32xf32, #tpu.memory_space<vmem>>, vector<8x32xf32>
    %c0_2 = arith.constant 0 : index
    %c0_3 = arith.constant 0 : index
    %6 = vector.load %arg4[%c0_2, %c0_3] : memref<8x32xf32, #tpu.memory_space<vmem>>, vector<8x32xf32>
    %c0_4 = arith.constant 0 : index
    %c0_5 = arith.constant 0 : index
    %c0_6 = arith.constant 0 : index
    %7 = vector.load %arg2[%c0_4, %c0_5, %c0_6] : memref<1x1x8xf32, #tpu.memory_space<vmem>>, vector<1x1x8xf32>
    %8 = vector.shape_cast %7 : vector<1x1x8xf32> to vector<1x8xf32>
    %9 = arith.subf %5, %6 : vector<8x32xf32>
    %10 = arith.mulf %9, %9 : vector<8x32xf32>
    %cst = arith.constant dense<0.000000e+00> : vector<8xf32>
    %11 = vector.multi_reduction <add>, %10, %cst [1] : vector<8x32xf32> to vector<8xf32>
    %12 = vector.shape_cast %11 : vector<8xf32> to vector<8x1xf32>
    %13 = math.sqrt %12 : vector<8x1xf32>
    %cst_7 = arith.constant 1.000000e+00 : f32
    %14 = vector.broadcast %cst_7 : f32 to vector<8x1xf32>
    %15 = arith.subf %14, %13 : vector<8x1xf32>
    %cst_8 = arith.constant 0.000000e+00 : f32
    %16 = vector.broadcast %cst_8 : f32 to vector<8x1xf32>
    %17 = arith.maximumf %15, %16 : vector<8x1xf32>
    %cst_9 = arith.constant 5.000000e-01 : f32
    %18 = vector.broadcast %cst_9 : f32 to vector<8x1xf32>
    %19 = arith.mulf %18, %12 : vector<8x1xf32>
    %cst_10 = arith.constant 5.000000e-01 : f32
    %20 = vector.broadcast %cst_10 : f32 to vector<8x1xf32>
    %21 = arith.mulf %20, %17 : vector<8x1xf32>
    %22 = arith.mulf %21, %17 : vector<8x1xf32>
    %23 = arith.subf %22, %19 : vector<8x1xf32>
    %c1_i32 = arith.constant 1 : i32
    %24 = arith.addi %1, %c1_i32 : i32
    %c8_i32 = arith.constant 8 : i32
    %25 = arith.muli %24, %c8_i32 : i32
    %c20_i32 = arith.constant 20 : i32
    %26 = arith.cmpi sgt, %25, %c20_i32 : i32
    %true = arith.constant true
    %27 = arith.xori %26, %true : i1
    %28 = arith.extui %27 : i1 to i32
    %c0_i32_11 = arith.constant 0 : i32
    %29 = arith.cmpi ne, %28, %c0_i32_11 : i32
    scf.if %29 {
      %32 = arith.truncf %23 : vector<8x1xf32> to vector<8x1xbf16>
      %33 = arith.extf %32 : vector<8x1xbf16> to vector<8x1xf32>
      %34 = arith.subf %23, %33 : vector<8x1xf32>
      %cst_13 = arith.constant dense<0.000000e+00> : vector<1x1xf32>
      %35 = tpu.matmul %8, %33, %cst_13 {dimension_numbers = #tpu.dot_dimension_numbers<[1], [0], [0], [1], [0, 0, 1, 1], [], []>} : vector<1x8xf32>, vector<8x1xf32>, vector<1x1xf32> -> vector<1x1xf32>
      %cst_14 = arith.constant dense<0.000000e+00> : vector<1x1xf32>
      %36 = tpu.matmul %8, %34, %cst_14 {dimension_numbers = #tpu.dot_dimension_numbers<[1], [0], [0], [1], [0, 0, 1, 1], [], []>} : vector<1x8xf32>, vector<8x1xf32>, vector<1x1xf32> -> vector<1x1xf32>
      %37 = arith.addf %35, %36 : vector<1x1xf32>
      %c0_15 = arith.constant 0 : index
      %c0_16 = arith.constant 0 : index
      %c0_17 = arith.constant 0 : index
      %38 = vector.load %arg5[%c0_15, %c0_16, %c0_17] : memref<1x1x1xf32, #tpu.memory_space<vmem>>, vector<1x1x1xf32>
      %39 = vector.shape_cast %19 : vector<8x1xf32> to vector<1x8x1xf32>
      %cst_18 = arith.constant dense<0.000000e+00> : vector<1xf32>
      %40 = vector.multi_reduction <add>, %39, %cst_18 [1, 2] : vector<1x8x1xf32> to vector<1xf32>
      %41 = vector.shape_cast %40 : vector<1xf32> to vector<1x1x1xf32>
      %42 = vector.extract %41[0, 0, 0] : f32 from vector<1x1x1xf32>
      %43 = vector.shape_cast %37 : vector<1x1xf32> to vector<1x1x1xf32>
      %cst_19 = arith.constant dense<0.000000e+00> : vector<1xf32>
      %44 = vector.multi_reduction <add>, %43, %cst_19 [1, 2] : vector<1x1x1xf32> to vector<1xf32>
      %45 = vector.shape_cast %44 : vector<1xf32> to vector<1x1x1xf32>
      %46 = vector.extract %45[0, 0, 0] : f32 from vector<1x1x1xf32>
      %47 = arith.addf %42, %46 : f32
      %48 = vector.broadcast %47 : f32 to vector<1x1x1xf32>
      %49 = arith.addf %38, %48 : vector<1x1x1xf32>
      %c0_20 = arith.constant 0 : index
      %c0_21 = arith.constant 0 : index
      %c0_22 = arith.constant 0 : index
      %50 = vector.load %arg5[%c0_20, %c0_21, %c0_22] : memref<1x1x1xf32, #tpu.memory_space<vmem>>, vector<1x1x1xf32>
      tpu.vector_store %arg5[%c0_20, %c0_21, %c0_22], %49 {strides = array<i32>} : memref<1x1x1xf32, #tpu.memory_space<vmem>>, vector<1x1x1xf32>,
    } else {
    }
    %30 = arith.extui %26 : i1 to i32
    %c0_i32_12 = arith.constant 0 : i32
    %31 = arith.cmpi ne, %30, %c0_i32_12 : i32
    scf.if %31 {
      %c8_i32_13 = arith.constant 8 : i32
      %32 = arith.muli %1, %c8_i32_13 : i32
      %33 = tpu.iota {dimensions = array<i32: 0>} : vector<8x1xi32>
      %34 = vector.broadcast %32 : i32 to vector<8x1xi32>
      %35 = arith.addi %34, %33 : vector<8x1xi32>
      %c20_i32_14 = arith.constant 20 : i32
      %36 = vector.broadcast %c20_i32_14 : i32 to vector<8x1xi32>
      %37 = arith.cmpi slt, %35, %36 : vector<8x1xi32>
      %cst_15 = arith.constant 0.000000e+00 : f32
      %38 = vector.broadcast %cst_15 : f32 to vector<8x1xf32>
      %39 = arith.select %37, %19, %38 : vector<8x1xi1>, vector<8x1xf32>
      %cst_16 = arith.constant 0.000000e+00 : f32
      %40 = vector.broadcast %cst_16 : f32 to vector<8x1xf32>
      %41 = arith.select %37, %23, %40 : vector<8x1xi1>, vector<8x1xf32>
      %42 = arith.truncf %41 : vector<8x1xf32> to vector<8x1xbf16>
      %43 = arith.extf %42 : vector<8x1xbf16> to vector<8x1xf32>
      %44 = arith.subf %41, %43 : vector<8x1xf32>
      %cst_17 = arith.constant dense<0.000000e+00> : vector<1x1xf32>
      %45 = tpu.matmul %8, %43, %cst_17 {dimension_numbers = #tpu.dot_dimension_numbers<[1], [0], [0], [1], [0, 0, 1, 1], [], []>} : vector<1x8xf32>, vector<8x1xf32>, vector<1x1xf32> -> vector<1x1xf32>
      %cst_18 = arith.constant dense<0.000000e+00> : vector<1x1xf32>
      %46 = tpu.matmul %8, %44, %cst_18 {dimension_numbers = #tpu.dot_dimension_numbers<[1], [0], [0], [1], [0, 0, 1, 1], [], []>} : vector<1x8xf32>, vector<8x1xf32>, vector<1x1xf32> -> vector<1x1xf32>
      %47 = arith.addf %45, %46 : vector<1x1xf32>
      %c0_19 = arith.constant 0 : index
      %c0_20 = arith.constant 0 : index
      %c0_21 = arith.constant 0 : index
      %48 = vector.load %arg5[%c0_19, %c0_20, %c0_21] : memref<1x1x1xf32, #tpu.memory_space<vmem>>, vector<1x1x1xf32>
      %49 = vector.shape_cast %39 : vector<8x1xf32> to vector<1x8x1xf32>
      %cst_22 = arith.constant dense<0.000000e+00> : vector<1xf32>
      %50 = vector.multi_reduction <add>, %49, %cst_22 [1, 2] : vector<1x8x1xf32> to vector<1xf32>
      %51 = vector.shape_cast %50 : vector<1xf32> to vector<1x1x1xf32>
      %52 = vector.extract %51[0, 0, 0] : f32 from vector<1x1x1xf32>
      %53 = vector.shape_cast %47 : vector<1x1xf32> to vector<1x1x1xf32>
      %cst_23 = arith.constant dense<0.000000e+00> : vector<1xf32>
      %54 = vector.multi_reduction <add>, %53, %cst_23 [1, 2] : vector<1x1x1xf32> to vector<1xf32>
      %55 = vector.shape_cast %54 : vector<1xf32> to vector<1x1x1xf32>
      %56 = vector.extract %55[0, 0, 0] : f32 from vector<1x1x1xf32>
      %57 = arith.addf %52, %56 : f32
      %58 = vector.broadcast %57 : f32 to vector<1x1x1xf32>
      %59 = arith.addf %48, %58 : vector<1x1x1xf32>
      %c0_24 = arith.constant 0 : index
      %c0_25 = arith.constant 0 : index
      %c0_26 = arith.constant 0 : index
      %60 = vector.load %arg5[%c0_24, %c0_25, %c0_26] : memref<1x1x1xf32, #tpu.memory_space<vmem>>, vector<1x1x1xf32>
      tpu.vector_store %arg5[%c0_24, %c0_25, %c0_26], %59 {strides = array<i32>} : memref<1x1x1xf32, #tpu.memory_space<vmem>>, vector<1x1x1xf32>,
    } else {
    }
    return
  }
  func.func @transform_0(%arg0: i32, %arg1: i32) -> (i32, i32, i32) {
    %c2_i32 = arith.constant 2 : i32
    %0 = arith.muli %arg0, %c2_i32 : i32
    %1 = arith.addi %0, %arg1 : i32
    %c2_i32_0 = arith.constant 2 : i32
    %2 = arith.minsi %1, %c2_i32_0 : i32
    %c0_i32 = arith.constant 0 : i32
    %c0_i32_1 = arith.constant 0 : i32
    %c0_i32_2 = arith.constant 0 : i32
    return %2, %c0_i32, %c0_i32_1 : i32, i32, i32
  }
  func.func @transform_1(%arg0: i32, %arg1: i32) -> (i32, i32) {
    %c2_i32 = arith.constant 2 : i32
    %0 = arith.muli %arg0, %c2_i32 : i32
    %1 = arith.addi %0, %arg1 : i32
    %c2_i32_0 = arith.constant 2 : i32
    %2 = arith.minsi %1, %c2_i32_0 : i32
    %c0_i32 = arith.constant 0 : i32
    %c0_i32_1 = arith.constant 0 : i32
    return %2, %c0_i32 : i32, i32
  }
  func.func @transform_2(%arg0: i32, %arg1: i32) -> (i32, i32) {
    %c2_i32 = arith.constant 2 : i32
    %0 = arith.muli %arg0, %c2_i32 : i32
    %1 = arith.addi %0, %arg1 : i32
    %c2_i32_0 = arith.constant 2 : i32
    %2 = arith.minsi %1, %c2_i32_0 : i32
    %c0_i32 = arith.constant 0 : i32
    %c0_i32_1 = arith.constant 0 : i32
    return %2, %c0_i32 : i32, i32
  }
  func.func @transform_3(%arg0: i32, %arg1: i32) -> (i32, i32, i32) {
    %c0_i32 = arith.constant 0 : i32
    %c0_i32_0 = arith.constant 0 : i32
    %c0_i32_1 = arith.constant 0 : i32
    return %arg0, %c0_i32, %c0_i32_0 : i32, i32, i32
  }
}

</mosaic_0001>

<bundles_post_ra>
// kernel: tpu_custom_call.1
= control target key start
LH: loop header
LB: loop body
LE: loop exit
PB: predicated region body
PF: predicated region fallthrough
CT: control target
= control target key end

     0   :  { %s1399_s0 = inlined_call_operand.hbm [shape: f32[3,1,8], index: 0, kind: input, shape index: {}]   ;;  %s1400_s1 = inlined_call_operand.hbm [shape: f32[20,32], index: 1, kind: input, shape index: {}]   ;;  %s1401_s2 = inlined_call_operand.hbm [shape: f32[20,32], index: 2, kind: input, shape index: {}]   ;;  %s1402_s3 = inlined_call_operand.vmem [shape: f32[2,1,1], index: 3, kind: output, shape index: {}]  }
   0x1   :  { %1409 = sst [smem:[#allocation10_spill]] %s1400_s1 }
   0x2   :  { %8 = vsyncpa [#allocation3], 0 }
   0x3   :  { %10 = vsyncpa [#allocation3 + $0x1], 0 }
   0x4   :  { %11 = vsyncpa [#allocation5], 0 }
   0x5   :  { %13 = vsyncpa [#allocation5 + $0x1], 0  ;;  %s1153_s12 = smov 0   ;;  %s1155_s13 = smov 0  }
   0x6   :  { %s1157_s14 = smov 0   ;;  %s1159_s15 = smov 0  }
   0x7   :  { %s1161_s16 = smov 0   ;;  %s1163_s17 = smov 0  }
   0x8   :  { %s1165_s18 = smov 0   ;;  %s1167_s19 = smov 0  }
   0x9 LB: > { %s1403_s20 = sadd.s32 4294967295, %s1123_s19   ;;  %s28_s21 = sadd.s32 1, %s1115_s17  ;;  %s1123_s19 = sphi %s1167_s19, %s19_s19   ;;  %s1119_s18 = sphi %s1165_s18, %s1429_s18   ;;  %s1115_s17 = sphi %s1163_s17, %s1428_s17   ;;  %s1111_s16 = sphi %s1161_s16, %s1427_s16   ;;  %s1107_s15 = sphi %s1159_s15, %s1426_s15   ;;  %s1103_s14 = sphi %s1157_s14, %s1425_s14   ;;  %s1099_s13 = sphi %s1155_s13, %s1424_s13   ;;  %s1095_s12 = sphi %s1153_s12, %s1423_s12  }
   0xa   : > { %p29_p0 = scmp.ge.s32.totalorder %s28_s21, 2  ;;  %s31_s22 = sadd.s32 1, %s1119_s18 }
   0xb   : > { %s804_s23 = sshll.u32 %s1119_s18, 1  ;;  %s46_s24 = sadd.s32 1, %s1103_s14 }
   0xc   : > { %s1431_s21 = smov (%p29_p0, %s28_s21), 0  ;;  %s1433_s22 = smov (!%p29_p0, %s31_s22), %s1119_s18 }
   0xd   : > { %s36_s25 = sadd.s32 %s1115_s17, %s804_s23  ;;  %p53_p1 = scmp.ne.s32.totalorder %s1103_s14, %s1099_s13 }
   0xe   : > { %p33_p2 = scmp.ge.s32.totalorder %s1433_s22, 2  ;;  %p37_p3 = scmp.lt.s32.totalorder %s36_s25, 2 }
   0xf   : > { %p54_p4 = scmp.eq.s32.totalorder %s1123_s19, 0  ;;  %p59_p5 = scmp.ne.s32.totalorder %s1099_s13, %s1095_s12 }
  0x10   : > { %s1435_s22 = smov (%p33_p2, %s1433_s22), 0  ;;  %s1437_s25 = smov (!%p37_p3, %s36_s25), 2 }
  0x11   : > { %1410 = sst [smem:[#allocation9_spill]] %s1435_s22  ;;  %s805_s26 = sshll.u32 %s1435_s22, 1 }
  0x12   : > { %p55_p6 = por %p54_p4, %p53_p1  ;;  %s40_s27 = sadd.s32 %s805_s26, %s1431_s21 }
  0x13   : > { %p60_p7 = scmp.eq.s32.totalorder %s1403_s20, 0  ;;  %p41_p8 = scmp.lt.s32.totalorder %s40_s27, 2 }
  0x14   : > { %p891_p10 = scmp.lt.s32.totalorder %s1123_s19, 4  ;;  %s1218_s29 = sand.u32 1, %s1103_s14  }
  0x15   : > { %p1212_p9 = por %p60_p7, %p59_p5  ;;  %s1439_s27 = smov (!%p41_p8, %s40_s27), 2 }
  0x16   : > { %p1220_p11 = pnand %p891_p10, %p55_p6  ;;  %s43_s4 = ssub.s32 %s1437_s25, %s1439_s27 }
  0x17   : > { %s1411_s28 = scalar_select %p1212_p9, 1, 0 }
  0x18   : > { %s1412_s30 = scalar_select %p1220_p11, 1, 0 }
  0x19   : > { %s198_s5 = sand.u32 1, %s1123_s19   ;;  %p44_p12 = scmp.eq.s32.totalorder %s43_s4, 0 }
  0x1a   : > { %s1405_s6 = sshll.u32 %s1218_s29, 3  ;;  %s816_s8 = sshll.u32 %s1437_s25, 7 }
  0x1b   : > { %s1228_s7 = scalar_select %p44_p12, %s1103_s14, %s46_s24  }
  0x1c   : > { %s1413_s1 = sld [smem:[#allocation10_spill]]  ;;  %s202_s12 = scalar_lea.vmem [#allocation4], %s1405_s6 }
  0x1d   : > { %s213_s23 = sshll.u32 %s202_s12, 4  ;;  %s1242_s26 = scalar_lea.sflag [#allocation5], %s198_s5  ;;  %s1240_s23 = int_to_ptr.vmem [resolvable:$true] %s213_s23 }
  0x1e   : > { %p1248_p0 = pneg %p1220_p11 }
  0x22   : > { %s1236_s11 = scalar_lea.hbm %s1413_s1, %s816_s8  ;;  %s968_s10 = scalar_lea.hbm %s1413_s1, 384 }
  0x23   : > { %s963_s24 = scalar_lea.hbm %s1236_s11, 128  ;;  %p969_p3 = scmp.lt.u32.totalorder %s1236_s11, %s1413_s1 }
  0x24   : > { %p964_p13 = scmp.ne.s32.totalorder %s1236_s11, %s963_s24  ;;  %p970_p4 = scmp.lt.u32.totalorder %s968_s10, %s963_s24 }
  0x25   : > { %p972_p6 = scmp.lt.u32.totalorder %s963_s24, %s1236_s11 }
  0x26   : > { %p966_p1 = pnand %p1248_p0, %p964_p13  ;;  %p971_p5 = por %p970_p4, %p969_p3 }
  0x28   : > { %p967_p2 = pneg %p966_p1  ;;  %p973_p7 = por %p972_p6, %p971_p5 }
  0x2a   : > { %p974_p8 = pnand %p973_p7, %p967_p2 }
  0x2c   : > { %977 = shalt.err (!%p974_p8)
}
  0x2d   : > { %s978_s5 = scalar_lea.vmem %s1240_s23, 128  ;;  %s1125_s4 = smov [#allocation4]  }
  0x2e   : > { %p979_p10 = scmp.ne.s32.totalorder %s1240_s23, %s978_s5  ;;  %s983_s9 = sshll.u32 %s1125_s4, 4  ;;  %s984_s9 = int_to_ptr.vmem [resolvable:$false] %s983_s9 }
  0x2f   : > { %s985_s20 = scalar_lea.vmem %s984_s9, 256  ;;  %p986_p1 = scmp.lt.s32.totalorder %s1240_s23, %s984_s9 }
  0x30   : > { %p981_p12 = pnand %p979_p10, %p1248_p0  ;;  %p987_p9 = scmp.lt.s32.totalorder %s985_s20, %s978_s5 }
  0x32   : > { %p982_p13 = pneg %p981_p12  ;;  %p988_p3 = por %p987_p9, %p986_p1 }
  0x34   : > { %p989_p4 = pnand %p988_p3, %p982_p13 }
  0x36   : > { %992 = shalt.err (!%p989_p4)
}
  0x37   : > { %887 = dma.hbm_to_vmem [thread:$0]  (!%p1220_p11), %s1236_s11, 128, %s1240_s23, %s1242_s26  }
  0x38   : > { %s1277_s12 = scalar_lea.hbm %s1401_s2, %s816_s8  ;;  %p820_p9 = scmp.ge.s32.totalorder %s1123_s19, 1 }
  0x39   : > { %p240_p2 = scmp.lt.s32.totalorder %s1123_s19, 5  ;;  %s813_s4 = sshll.u32 %s1437_s25, 4 }
  0x3a   : > { %s180_s9 = scalar_lea.vmem [#allocation2], %s1218_s29  ;;  %s1290_s22 = scalar_lea.hbm %s1399_s0, %s813_s4 }
  0x3b   : > { %p1281_p5 = pnand %p820_p9, %p240_p2  ;;  %s191_s20 = sshll.u32 %s180_s9, 4  ;;  %s192_s20 = int_to_ptr.vmem [resolvable:$true] %s191_s20 }
  0x3c   : > { %s178_s8 = scalar_lea.sflag [#allocation3], %s1218_s29  ;;  %s993_s11 = scalar_lea.hbm %s1290_s22, 16 }
  0x3d   : > { %s1415_s5 = scalar_select %p1281_p5, 1, 0 }
  0x3e   : > { %p994_p6 = scmp.ne.s32.totalorder %s1290_s22, %s993_s11  ;;  %s998_s24 = scalar_lea.hbm %s1399_s0, 48 }
  0x3f   : > { %p999_p10 = scmp.lt.u32.totalorder %s1290_s22, %s1399_s0  ;;  %p1000_p12 = scmp.lt.u32.totalorder %s998_s24, %s993_s11 }
  0x40   : > { %p996_p7 = pnand %p994_p6, %p1248_p0  ;;  %p1002_p1 = scmp.lt.u32.totalorder %s993_s11, %s1290_s22 }
  0x41   : > { %p1001_p13 = por %p1000_p12, %p999_p10 }
  0x42   : > { %p997_p8 = pneg %p996_p7 }
  0x43   : > { %p1003_p3 = por %p1002_p1, %p1001_p13 }
  0x45   : > { %p1004_p4 = pnand %p1003_p3, %p997_p8 }
  0x47   : > { %1007 = shalt.err (!%p1004_p4)
}
  0x48   : > { %s1008_s1 = scalar_lea.vmem %s192_s20, 16  ;;  %s1126_s6 = smov [#allocation2]  }
  0x49   : > { %p1009_p9 = scmp.ne.s32.totalorder %s192_s20, %s1008_s1  ;;  %s1013_s4 = sshll.u32 %s1126_s6, 4  ;;  %s1014_s4 = int_to_ptr.vmem [resolvable:$false] %s1013_s4 }
  0x4a   : > { %s1015_s23 = scalar_lea.vmem %s1014_s4, 32  ;;  %p1016_p7 = scmp.lt.s32.totalorder %s192_s20, %s1014_s4 }
  0x4b   : > { %p1011_p2 = pnand %p1009_p9, %p1248_p0  ;;  %p1017_p5 = scmp.lt.s32.totalorder %s1015_s23, %s1008_s1 }
  0x4d   : > { %p1012_p6 = pneg %p1011_p2  ;;  %p1018_p11 = por %p1017_p5, %p1016_p7 }
  0x4f   : > { %p1019_p10 = pnand %p1018_p11, %p1012_p6 }
  0x51   : > { %1022 = shalt.err (!%p1019_p10)
}
  0x52   : > { %p1416_p12 = scmp.ne.s32.totalorder %s1412_s30, 0  ;;  %s1417_s11 = sshll.u32 %s1218_s29, 3 }
  0x53   : > { %s224_s25 = scalar_lea.vmem [#allocation6], %s1417_s11  ;;  %s1023_s10 = scalar_lea.hbm %s1277_s12, 128 }
  0x54   : > { %884 = dma.hbm_to_vmem [thread:$0]  (!%p1416_p12), %s1290_s22, 16, %s192_s20, %s178_s8  }
  0x55   : > { %s235_s24 = sshll.u32 %s224_s25, 4  ;;  %p1024_p8 = scmp.ne.s32.totalorder %s1277_s12, %s1023_s10  ;;  %s236_s24 = int_to_ptr.vmem [resolvable:$true] %s235_s24 }
  0x56   : > { %s1028_s6 = scalar_lea.hbm %s1401_s2, 384  ;;  %p1029_p13 = scmp.lt.u32.totalorder %s1277_s12, %s1401_s2 }
  0x57   : > { %p1026_p5 = pnand %p1024_p8, %p1248_p0  ;;  %p1030_p1 = scmp.lt.u32.totalorder %s1028_s6, %s1023_s10 }
  0x58   : > { %p1032_p4 = scmp.lt.u32.totalorder %s1023_s10, %s1277_s12 }
  0x59   : > { %p1027_p11 = pneg %p1026_p5  ;;  %p1031_p3 = por %p1030_p1, %p1029_p13 }
  0x5b   : > { %p1033_p9 = por %p1032_p4, %p1031_p3 }
  0x5d   : > { %p1034_p2 = pnand %p1033_p9, %p1027_p11 }
  0x5f   : > { %1037 = shalt.err (!%p1034_p2)
}
  0x60   : > { %s1038_s22 = scalar_lea.vmem %s236_s24, 128  ;;  %s1127_s29 = smov [#allocation6]  }
  0x61   : > { %p1039_p6 = scmp.ne.s32.totalorder %s236_s24, %s1038_s22  ;;  %s1043_s20 = sshll.u32 %s1127_s29, 4  ;;  %s1044_s20 = int_to_ptr.vmem [resolvable:$false] %s1043_s20 }
  0x62   : > { %s1045_s8 = scalar_lea.vmem %s1044_s20, 256  ;;  %p1046_p8 = scmp.lt.s32.totalorder %s236_s24, %s1044_s20 }
  0x63   : > { %p1041_p7 = pnand %p1039_p6, %p1248_p0  ;;  %p1047_p5 = scmp.lt.s32.totalorder %s1045_s8, %s1038_s22 }
  0x65   : > { %p1042_p10 = pneg %p1041_p7  ;;  %p1048_p12 = por %p1047_p5, %p1046_p8 }
  0x67   : > { %p1049_p1 = pnand %p1048_p12, %p1042_p10 }
  0x69   : > { %1052 = shalt.err (!%p1049_p1)
}
  0x6a   : > { %p1418_p13 = scmp.ne.s32.totalorder %s1412_s30, 0  ;;  %p1419_p11 = scmp.ne.s32.totalorder %s1415_s5, 0 }
  0x6b   : > { %s246_s27 = sand.u32 (!%p1419_p11), 1, %s1099_s13   ;;  %p1420_p0 = scmp.ne.s32.totalorder (!%p1419_p11), %s1411_s28, 0 }
  0x6c   : > { %890 = dma.hbm_to_vmem [thread:$0]  (!%p1418_p13), %s1277_s12, 128, %s236_s24, %s1242_s26  }
  0x6d   : > { %244 = sbr.rel (%p1419_p11) target bundleno = 868 (0x364), region = 32  ;;  %s247_s11 = scalar_lea.sflag (!%p1419_p11), [#allocation3], %s246_s27 }
  0x6e   : > { %s249_s25 = scalar_lea.vmem (!%p1419_p11), [#allocation2], %s246_s27 }
  0x74   : > { %1086 = dma.done.wait (%p1420_p0), %s247_s11, 16  }
  0x75   : > { %1088 = vsyncadd (%p1420_p0), %s247_s11, 4294967280  ;;  %s1421_s10 = sadd.s32 4294967295, %s1123_s19   ;;  %s821_s9 = sshll.u32 %s246_s27, 3 }
  0x76   : > { %s254_s30 = sand.u32 1, %s1421_s10   ;;  %s258_s26 = scalar_lea.vmem [#allocation4], %s821_s9 }
  0x77   : > { %s255_s1 = scalar_lea.sflag [#allocation5], %s254_s30 }
  0x78   : > { %1090 = dma.done.wait (%p1420_p0), %s255_s1, 256  }
  0x79   : > { %1092 = vsyncadd (%p1420_p0), %s255_s1, 4294967040  ;;  %p309_p12 = scmp.lt.s32.totalorder %s1111_s16, 1  ;;  %s823_s12 = sshll.u32 %s1111_s16, 1 }
  0x7a   : > { %s1347_s5 = sadd.s32 %s1107_s15, %s823_s12  ;;  %s267_s23 = scalar_lea.vmem [#allocation6], %s821_s9 }
  0x7b   : > { %s1441_s16 = smov (!%p309_p12, %s1111_s16), 1  ;;  %p824_p3 = scmp.ne.s32.totalorder %s1107_s15, 0 }
  0x7c   : > { %s1352_s4 = scalar_lea.vmem %s1402_s3, %s1441_s16  ;;  %vm318_vm0 = vcmask (!%p824_p3), 0   ;;  %v1128_v0 = vmov (!%p824_p3), 0.0  }
  0x7d   : > { %317 = sbr.rel (%p824_p3) target bundleno = 132 (0x84), region = 48  ;;  %319 = vst.msk [vmem:[%s1352_s4] sm:$0x1] (!%p824_p3), %vm318_vm0, %v1128_v0 }
  0x84 PF: > { %v320_v1 = vld [vmem:[%s258_s26] sm:$0xff]  ;;  %v321_v2 = vld [vmem:[%s267_s23] sm:$0xff]  ;;  %vm325_vm1 = vcmask 261120   ;;  %s835_s16 = sshll.u32 %s1347_s5, 3 }
  0x85   : > { %v1356_v3 = vld [vmem:[%s249_s25] sm:$0x1]  ;;  %v323_v4 = vsub.f32 %v320_v1, %v321_v2  ;;  %s1361_s15 = sadd.s32 8, %s835_s16 }
  0x86   : > { %p826_p4 = scmp.gt.s32.totalorder %s1361_s15, 20 }
  0x87   : > { %v324_v5 = vmul.f32 %v323_v4, %v323_v4  ;;  %v1129_v20 = vmov (!%p826_p4), 0.0   ;;  %vm497_vm4 = vcmask (!%p826_p4), 7168   ;;  %vm1130_vm5 = vmmov (!%p826_p4), 0   ;;  %v496_v36 = vld [vmem:[%s1352_s4] sm:$0x1] (!%p826_p4) }
  0x88   : > { %850 = vmatprep.subr.mxu0 (!%p826_p4), %v1129_v20  ;;  %845 = vmatprep.subr.mxu1 (!%p826_p4), %v1129_v20  ;;  %vm352_vm6 = vcmask (!%p826_p4), 64512   ;;  %vm513_vm7 = vcmask (!%p826_p4), 0  }
  0x89   : > { %v326_v6 = vsel %vm325_vm1, %v324_v5, 0.0  ;;  %852 = vmatprep.mubr.msk.f32.mxu0 (!%p826_p4), %vm1130_vm5, %v1129_v20  ;;  %847 = vmatprep.mubr.msk.f32.mxu1 (!%p826_p4), %vm1130_vm5, %v1129_v20 }
  0x8a   : > { %327 = vadd.xlane.f32.xlu0 %v326_v6 }
 0x117   : > { %v328_v7 = vpop.xlane.xlu0 %327 }
 0x118   : > { %961 = vrsqrt.f32 %v328_v7  ;;  %vm331_vm2 = vcmp.eq.f32.partialorder %v328_v7, inf  ;;  %v334_v10 = vand.u32 2147483648, %v328_v7  ;;  %vm333_vm3 = vcmp.eq.f32.partialorder %v328_v7, 0.0 }
 0x119   : > { %v338_v16 = vmul.f32 0.5, %v328_v7 }
 0x11b   : > { %v498_v22 = vsel (!%p826_p4), %vm497_vm4, %v338_v16, 0.0 }
 0x11c   : > { %499 = vadd.xlane.f32.xlu0 (!%p826_p4), %v498_v22 }
 0x122   : > { %v962_v8 = vpop.eup %961 }
 0x123   : > { %v330_v9 = vmul.f32 %v962_v8, %v328_v7 }
 0x125   : > { %v332_v11 = vsel %vm331_vm2, %v328_v7, %v330_v9 }
 0x126   : > { %v335_v12 = vsel %vm333_vm3, %v334_v10, %v332_v11 }
 0x127   : > { %v336_v13 = vsub.f32 1.0, %v335_v12 }
 0x129   : > { %v337_v14 = vmax.f32 %v336_v13, 0.0  ;;  %348 = sbr.rel (%p826_p4) target bundleno = 582 (0x246), region = 52 }
 0x12b   : > { %v339_v15 = vmul.f32 0.5, %v337_v14 }
 0x12d   : > { %v340_v17 = vmul.f32 %v339_v15, %v337_v14 }
 0x12f   : > { %v341_v18 = vsub.f32 %v340_v17, %v338_v16 }
 0x131   : > { %v349_v19 = vpack.c.bf16 %v341_v18, %v341_v18 }
 0x133   : > { %v350_v21 = vunpack.c.l.bf16 %v349_v19 }
 0x135   : > { %851 = vmatpush3.msra.mxu0 %v350_v21  ;;  %v351_v23 = vsub.f32 %v341_v18, %v350_v21 }
 0x136   : > { %853 = vmatmul.mubr.msk.f32.vlgmr.msra.gmra.mrb[0].mxu0 %vm352_vm6, %v1356_v3 }
 0x137   : > { %846 = vmatpush3.msra.mxu1 %v351_v23 }
 0x138   : > { %848 = vmatmul.mubr.msk.f32.vlgmr.msra.gmra.mrb[0].mxu1 %vm352_vm6, %v1356_v3 }
 0x1a9   : > { %v500_v24 = vpop.xlane.xlu0 %499 }
 0x1aa   : > { %v501_v25 = vrot.slane %v500_v24, 4 }
 0x1ac   : > { %v502_v26 = vadd.f32 %v501_v25, %v500_v24 }
 0x1ae   : > { %v503_v27 = vrot.slane %v502_v26, 2 }
 0x1b0   : > { %v504_v28 = vadd.f32 %v503_v27, %v502_v26 }
 0x1b2   : > { %v505_v29 = vrot.slane %v504_v28, 1 }
 0x1b4   : > { %v506_v30 = vadd.f32 %v505_v29, %v504_v28 }
 0x1b6   : > { %867 = vpush %v506_v30 }
 0x1e7   : > { %s868_s28 = spop %867 }
 0x209   : > { %v492_v31 = vpop.f32.mrb[0].mxu0 }
 0x20a   : > { %v854_v32 = vpop.f32.mrb[1].mxu0 }
 0x20b   : > { %v422_v33 = vpop.f32.mrb[0].mxu1 }
 0x20c   : > { %v493_v34 = vadd.f32 %v492_v31, %v422_v33  ;;  %v849_v35 = vpop.f32.mrb[1].mxu1 }
 0x20e   : > { %869 = vpush %v493_v34 }
 0x23f   : > { %s870_s22 = spop %869 }
 0x240   : > { %s510_s29 = sadd.f32 %s870_s22, %s868_s28 }
 0x242   : > { %v511_v37 = vstv %s510_s29 }
 0x243   : > { %v512_v38 = vadd.f32 %v511_v37, %v496_v36 }
 0x245   : > { %514 = vst.msk [vmem:[%s1352_s4] sm:$0x1] %vm513_vm7, %v512_v38 }
 0x246 PF: > { %p829_p9 = scmp.le.s32.totalorder %s1361_s15, 20 }
 0x247   : > { %v519_v39 = vlaneseq (!%p829_p9)  ;;  %v1131_v40 = vmov (!%p829_p9), 0.0   ;;  %v521_v41 = vstv (!%p829_p9), %s835_s16  ;;  %vm1132_vm8 = vmmov (!%p829_p9), 0  }
 0x248   : > { %517 = sbr.rel (%p829_p9) target bundleno = 868 (0x364), region = 56  ;;  %860 = vmatprep.subr.mxu0 (!%p829_p9), %v1131_v40  ;;  %855 = vmatprep.subr.mxu1 (!%p829_p9), %v1131_v40  ;;  %vm674_vm9 = vcmask (!%p829_p9), 7168   ;;  %vm529_vm11 = vcmask (!%p829_p9), 64512   ;;  %vm690_vm12 = vcmask (!%p829_p9), 0  }
 0x249   : > { %v520_v42 = vshrl.u32 (!%p829_p9), %v519_v39, 7  ;;  %862 = vmatprep.mubr.msk.f32.mxu0 (!%p829_p9), %vm1132_vm8, %v1131_v40  ;;  %857 = vmatprep.mubr.msk.f32.mxu1 (!%p829_p9), %vm1132_vm8, %v1131_v40 }
 0x24b   : > { %v522_v43 = vadd.s32 (!%p829_p9), %v521_v41, %v520_v42 }
 0x24c   : > { %v673_v62 = vld [vmem:[%s1352_s4] sm:$0x1] (!%p829_p9) }
 0x24d   : > { %vm523_vm10 = vcmp.lt.s32.totalorder (!%p829_p9), %v522_v43, 20 }
 0x24e   : > { %v525_v44 = vsel (!%p829_p9), %vm523_vm10, %v341_v18, 0.0  ;;  %v524_v45 = vsel (!%p829_p9), %vm523_vm10, %v338_v16, 0.0 }
 0x24f   : > { %v526_v46 = vpack.c.bf16 %v525_v44, %v525_v44  ;;  %v675_v47 = vsel %vm674_vm9, %v524_v45, 0.0 }
 0x250   : > { %676 = vadd.xlane.f32.xlu0 %v675_v47 }
 0x251   : > { %v527_v48 = vunpack.c.l.bf16 %v526_v46 }
 0x253   : > { %861 = vmatpush3.msra.mxu0 %v527_v48  ;;  %v528_v49 = vsub.f32 %v525_v44, %v527_v48 }
 0x254   : > { %863 = vmatmul.mubr.msk.f32.vlgmr.msra.gmra.mrb[0].mxu0 %vm529_vm11, %v1356_v3 }
 0x255   : > { %856 = vmatpush3.msra.mxu1 %v528_v49 }
 0x256   : > { %858 = vmatmul.mubr.msk.f32.vlgmr.msra.gmra.mrb[0].mxu1 %vm529_vm11, %v1356_v3 }
 0x2dd   : > { %v677_v50 = vpop.xlane.xlu0 %676 }
 0x2de   : > { %v678_v51 = vrot.slane %v677_v50, 4 }
 0x2e0   : > { %v679_v52 = vadd.f32 %v678_v51, %v677_v50 }
 0x2e2   : > { %v680_v53 = vrot.slane %v679_v52, 2 }
 0x2e4   : > { %v681_v54 = vadd.f32 %v680_v53, %v679_v52 }
 0x2e6   : > { %v682_v55 = vrot.slane %v681_v54, 1 }
 0x2e8   : > { %v683_v56 = vadd.f32 %v682_v55, %v681_v54 }
 0x2ea   : > { %871 = vpush %v683_v56 }
 0x31b   : > { %s872_s20 = spop %871 }
 0x327   : > { %v669_v57 = vpop.f32.mrb[0].mxu0 }
 0x328   : > { %v864_v58 = vpop.f32.mrb[1].mxu0 }
 0x329   : > { %v599_v59 = vpop.f32.mrb[0].mxu1 }
 0x32a   : > { %v670_v60 = vadd.f32 %v669_v57, %v599_v59  ;;  %v859_v61 = vpop.f32.mrb[1].mxu1 }
 0x32c   : > { %873 = vpush %v670_v60 }
 0x35d   : > { %s874_s8 = spop %873 }
 0x35e   : > { %s687_s27 = sadd.f32 %s874_s8, %s872_s20 }
 0x360   : > { %v688_v63 = vstv %s687_s27 }
 0x361   : > { %v689_v0 = vadd.f32 %v688_v63, %v673_v62 }
 0x363   : > { %691 = vst.msk [vmem:[%s1352_s4] sm:$0x1] %vm690_vm12, %v689_v0 }
 0x364 PF: > { %s19_s19 = sadd.s32 1, %s1123_s19   ;;  %s1422_s11 = sld [smem:[#allocation9_spill]] }
 0x365   : > { %p16_p2 = scmp.ge.s32.totalorder %s19_s19, 6   ;;  %s1423_s12 = smov %s1099_s13 }
 0x366   : > { %s1424_s13 = smov %s1103_s14  ;;  %s1425_s14 = smov %s1228_s7 }
 0x367   : > { %s1426_s15 = smov %s1115_s17  ;;  %s1427_s16 = smov %s1119_s18 }
 0x368   : > { %s1428_s17 = smov %s1431_s21  ;;  %18 = sbr.rel (!%p16_p2) target bundleno = 9 (0x9), region = 108 }
 0x36a   : > { %s1429_s18 = smov %s1422_s11 }
 0x36f   :  { %709 = vsyncpa [#allocation3], 1 }
 0x370   :  { %711 = vsyncpa [#allocation3 + $0x1], 1 }
 0x371   :  { %712 = vsyncpa [#allocation5], 1 }
 0x372   :  { %714 = vsyncpa [#allocation5 + $0x1], 1 }

</bundles_post_ra>
